<compile_context>
chip_gen: v5e
topology: v5e:2x2
jax: 0.10.0
libtpu: 0.0.40
codegen_flags: <defaults>
</compile_context>

<pallas_src>
import math

import jax
import jax.numpy as jnp
from jax.experimental import pallas as pl
from jax.experimental.pallas import tpu as pltpu


# ----------------------------------------------------------------------------
# One fused kernel for the whole 4-step generation.
# grid = (B, T):  b is batch-parallel (uses both TCs on v7x), t is the
# sequential timestep axis; the output block (same block index for every t)
# is the VMEM-resident latent state.
# All tensors inside are feature-major: features (C or D) on sublanes,
# spatial tokens (HW = 256) on lanes.
# ----------------------------------------------------------------------------
def dmd_generate_kernel(x_ref, ctxk_ref, ctxv_ref, bias_ref,
                        w_in_ref, wq_ref, wk_ref, wv_ref, wo_ref,
                        w_out_ref, b_out_ref,
                        sched_ref,     # SMEM (T,4): alpha_t, sigma_t, alpha_prev, sigma_prev
                        o_ref):
    t = pl.program_id(1)

    # Seed the VMEM-resident latent at the first timestep of each batch elem.
    @pl.when(t == 0)
    def _():
        o_ref[...] = x_ref[...]

    x = o_ref[...].astype(jnp.float32)             # (C, HW)  noisy latent
    ctx_tok = ctxk_ref[...].astype(jnp.float32)    # (S, D)   text ctx, token-major
    ctx_fm = ctxv_ref[...].astype(jnp.float32)     # (D, S)   text ctx, feature-major
    bias = bias_ref[...]                           # (D, 1)   conv_in bias + temb(t)

    w_in = w_in_ref[...].astype(jnp.float32)       # (D, C)   = conv_in weight^T
    wq = wq_ref[...].astype(jnp.float32)           # (D, D)   = Wq^T
    wk = wk_ref[...].astype(jnp.float32)           # (D, D)   = Wk
    wv = wv_ref[...].astype(jnp.float32)           # (D, D)   = Wv^T
    wo = wo_ref[...].astype(jnp.float32)           # (D, D)   = Wo^T
    w_out = w_out_ref[...].astype(jnp.float32)     # (C, D)   = conv_out weight^T
    b_out = b_out_ref[...]                         # (C, 1)

    D = wq.shape[0]

    # conv_in (1x1 conv == per-token matmul) + timestep conditioning + SiLU.
    h = jnp.dot(w_in, x, preferred_element_type=jnp.float32) + bias      # (D, HW)
    h = h * jax.nn.sigmoid(h)

    # Cross-attention: queries from spatial tokens, keys/values from text ctx.
    # All contractions are plain (M,K)@(K,N) matmuls — no in-kernel transposes.
    q = jnp.dot(wq, h, preferred_element_type=jnp.float32)               # (D, HW)
    k = jnp.dot(ctx_tok, wk, preferred_element_type=jnp.float32)         # (S, D)
    v = jnp.dot(wv, ctx_fm, preferred_element_type=jnp.float32)          # (D, S)

    s = jnp.dot(k, q, preferred_element_type=jnp.float32)                # (S, HW)
    s = s * (1.0 / math.sqrt(D))
    m = jnp.max(s, axis=0, keepdims=True)                                # (1, HW)
    p = jnp.exp(s - m)
    p = p / jnp.sum(p, axis=0, keepdims=True)        # exact softmax (no approx recip)
    a = jnp.dot(v, p, preferred_element_type=jnp.float32)                # (D, HW)
    h = h + jnp.dot(wo, a, preferred_element_type=jnp.float32)

    # conv_out (1x1 conv) -> predicted noise eps.
    eps = jnp.dot(w_out, h, preferred_element_type=jnp.float32) + b_out  # (C, HW)

    # Deterministic LCM/DDIM-style scheduler update (guidance_scale = 0),
    # lane-dense on (C, HW); result stays resident in the output block.
    alpha_t = sched_ref[t, 0]
    sigma_t = sched_ref[t, 1]
    alpha_p = sched_ref[t, 2]
    sigma_p = sched_ref[t, 3]
    pred_x0 = (x - sigma_t * eps) * (1.0 / alpha_t)
    o_ref[...] = (alpha_p * pred_x0 + sigma_p * eps).astype(o_ref.dtype)


def dmd_generate(x_lat, ctx_tok, ctx_fm, bias_tab, weights, sched_tab):
    """Run all T denoising steps in one pallas_call.

    x_lat:    (B, C, HW) f32     ctx_tok: (B, S, D) bf16   ctx_fm: (B, D, S) bf16
    bias_tab: (T, D, 1) f32      sched_tab: (T, 4) f32
    """
    B, C, HW = x_lat.shape
    S, D = ctx_tok.shape[1], ctx_tok.shape[2]
    T = sched_tab.shape[0]
    w_in_t, wq_t, wk, wv_t, wo_t, w_out_t, b_out_c = weights

    const2 = lambda shape: pl.BlockSpec(shape, lambda b, t: (0, 0))

    # NOTE(v7x): at real-SDXL sizes (D ~ 1280-2048) the resident f32 weights
    # would blow past the 64 MiB VMEM; use bf16 weights + a K-reduction grid
    # axis and set vmem_limit_bytes explicitly.  At D=32 nothing is needed.
    return pl.pallas_call(
        dmd_generate_kernel,
        out_shape=jax.ShapeDtypeStruct((B, C, HW), jnp.float32),
        grid_spec=pltpu.PrefetchScalarGridSpec(
            num_scalar_prefetch=0,
            grid=(B, T),
            in_specs=[
                pl.BlockSpec((pl.Squeezed(), C, HW), lambda b, t: (b, 0, 0)),  # latent
                pl.BlockSpec((pl.Squeezed(), S, D), lambda b, t: (b, 0, 0)),   # ctx (K path)
                pl.BlockSpec((pl.Squeezed(), D, S), lambda b, t: (b, 0, 0)),   # ctx (V path)
                pl.BlockSpec((pl.Squeezed(), D, 1), lambda b, t: (t, 0, 0)),   # bias+temb(t)
                const2((D, C)),              # conv_in weight^T
                const2((D, D)),              # Wq^T
                const2((D, D)),              # Wk
                const2((D, D)),              # Wv^T
                const2((D, D)),              # Wo^T
                const2((C, D)),              # conv_out weight^T
                const2((C, 1)),              # conv_out bias
                pl.BlockSpec(memory_space=pltpu.MemorySpace.SMEM),             # sched (T,4)
            ],
            out_specs=pl.BlockSpec((pl.Squeezed(), C, HW), lambda b, t: (b, 0, 0)),
        ),
        compiler_params=pltpu.CompilerParams(
            dimension_semantics=("parallel", "arbitrary")),
    )(x_lat, ctx_tok, ctx_fm, bias_tab,
      w_in_t, wq_t, wk, wv_t, wo_t, w_out_t, b_out_c, sched_tab)


# ----------------------------------------------------------------------------
# Glue: parameter init, timestep embedding, noise schedule, layout plumbing.
# ----------------------------------------------------------------------------
def sinusoidal_temb(t, dim):
    half = dim // 2
    freqs = jnp.exp(-math.log(10000.0) * jnp.arange(half, dtype=jnp.float32) / half)
    args = jnp.float32(t) * freqs
    return jnp.concatenate([jnp.sin(args), jnp.cos(args)])      # (dim,)


def init_params(key, C, D):
    ks = jax.random.split(key, 8)
    scl = lambda k, shape, fan: (jax.random.normal(k, shape, jnp.float32)
                                 / math.sqrt(fan))
    w_in = scl(ks[0], (C, D), C)
    b_in = jnp.zeros((1, D), jnp.float32)
    wq = scl(ks[1], (D, D), D)
    wk = scl(ks[2], (D, D), D)
    wv = scl(ks[3], (D, D), D)
    wo = scl(ks[4], (D, D), D)
    w_out = scl(ks[5], (D, C), D)
    b_out = jnp.zeros((1, C), jnp.float32)
    return (w_in, b_in, wq, wk, wv, wo, w_out, b_out)


@jax.jit
def dmd_forward(x_nchw, ctx, params):
    """4-step DMD2-style deterministic sampling on the latent (one kernel)."""
    B, C, H, W = x_nchw.shape
    D = ctx.shape[-1]
    timesteps = (999, 749, 499, 249)
    w_in, b_in, wq, wk, wv, wo, w_out, b_out = params

    # SD-style scaled-linear beta schedule -> alphas_cumprod.
    betas = jnp.linspace(0.00085 ** 0.5, 0.012 ** 0.5, 1000,
                         dtype=jnp.float32) ** 2
    acp = jnp.cumprod(1.0 - betas)
    ts = jnp.array(timesteps, dtype=jnp.int32)
    alpha_t = jnp.sqrt(acp[ts])
    sigma_t = jnp.sqrt(1.0 - acp[ts])
    tp = jnp.array(timesteps[1:], dtype=jnp.int32)
    alpha_p = jnp.concatenate([jnp.sqrt(acp[tp]), jnp.ones((1,), jnp.float32)])
    sigma_p = jnp.concatenate([jnp.sqrt(1.0 - acp[tp]), jnp.zeros((1,), jnp.float32)])
    sched_tab = jnp.stack([alpha_t, sigma_t, alpha_p, sigma_p], axis=1)   # (T, 4)

    # Per-step conditioning: conv_in bias + sinusoidal timestep embedding, folded.
    temb = jnp.stack([sinusoidal_temb(t, D) for t in timesteps])          # (T, D)
    bias_tab = (temb + b_in)[:, :, None].astype(jnp.float32)              # (T, D, 1)

    # Feature-major, bf16 weight layout (one-time wrapper-side plumbing).
    bf = lambda a: a.astype(jnp.bfloat16)
    weights = (bf(w_in.T), bf(wq.T), bf(wk), bf(wv.T), bf(wo.T), bf(w_out.T),
               b_out.reshape(-1, 1).astype(jnp.float32))

    # NCHW -> (B, C, H*W): channels on sublanes, 256 spatial tokens on lanes
    # (a free reshape, no transpose).
    x_lat = x_nchw.reshape(B, C, H * W).astype(jnp.float32)
    ctx_tok = ctx.astype(jnp.bfloat16)            # (B, S, D) for the K projection
    ctx_fm = jnp.swapaxes(ctx_tok, 1, 2)          # (B, D, S) for the V projection

    out = dmd_generate(x_lat, ctx_tok, ctx_fm, bias_tab, weights, sched_tab)
    return out.reshape(B, C, H, W)                # back to NCHW


if __name__ == "__main__":
    key = jax.random.PRNGKey(0)
    k_lat, k_ctx, k_par = jax.random.split(key, 3)

    B, C, H, W = 2, 4, 16, 16     # latent (NCHW, like SDXL latents)
    S, D = 8, 32                  # text-context length / hidden dim

    x0 = jax.random.normal(k_lat, (B, C, H, W), jnp.float32)   # initial noise
    ctx = jax.random.normal(k_ctx, (B, S, D), jnp.float32)     # "prompt" embedding
    params = init_params(k_par, C, D)

    image = dmd_forward(x0, ctx, params)
    jax.block_until_ready(image)
    assert image.shape == (B, C, H, W)
    assert bool(jnp.all(jnp.isfinite(image)))
    print("KERNEL_OK")
</pallas_src>

<mosaic_0001>
module attributes {stable_mosaic.version = 11 : i64} {
  func.func @dmd_generate_kernel(%arg0: i32, %arg1: i32, %arg2: memref<1x4x256xf32, #tpu.memory_space<vmem>>, %arg3: memref<1x8x32xbf16, #tpu.memory_space<vmem>>, %arg4: memref<1x32x8xbf16, #tpu.memory_space<vmem>>, %arg5: memref<1x32x1xf32, #tpu.memory_space<vmem>>, %arg6: memref<32x4xbf16, #tpu.memory_space<vmem>>, %arg7: memref<32x32xbf16, #tpu.memory_space<vmem>>, %arg8: memref<32x32xbf16, #tpu.memory_space<vmem>>, %arg9: memref<32x32xbf16, #tpu.memory_space<vmem>>, %arg10: memref<32x32xbf16, #tpu.memory_space<vmem>>, %arg11: memref<4x32xbf16, #tpu.memory_space<vmem>>, %arg12: memref<4x1xf32, #tpu.memory_space<vmem>>, %arg13: memref<4x4xf32, #tpu.memory_space<smem>>, %arg14: memref<1x4x256xf32, #tpu.memory_space<vmem>>) attributes {dimension_semantics = [#tpu.dimension_semantics<parallel>, #tpu.dimension_semantics<arbitrary>], iteration_bounds = array<i64: 2, 4>, scalar_prefetch = 0 : i64, scratch_operands = 0 : i64, tpu.core_type = #tpu.core_type<tc>, window_params = [{transform_indices = @transform_0, window_bounds = array<i64: 1, 4, 256>}, {transform_indices = @transform_1, window_bounds = array<i64: 1, 8, 32>}, {transform_indices = @transform_2, window_bounds = array<i64: 1, 32, 8>}, {transform_indices = @transform_3, window_bounds = array<i64: 1, 32, 1>}, {pipeline_mode = #tpu.pipeline_mode<synchronous>, transform_indices = @transform_4, window_bounds = array<i64: 32, 4>}, {pipeline_mode = #tpu.pipeline_mode<synchronous>, transform_indices = @transform_5, window_bounds = array<i64: 32, 32>}, {pipeline_mode = #tpu.pipeline_mode<synchronous>, transform_indices = @transform_6, window_bounds = array<i64: 32, 32>}, {pipeline_mode = #tpu.pipeline_mode<synchronous>, transform_indices = @transform_7, window_bounds = array<i64: 32, 32>}, {pipeline_mode = #tpu.pipeline_mode<synchronous>, transform_indices = @transform_8, window_bounds = array<i64: 32, 32>}, {pipeline_mode = #tpu.pipeline_mode<synchronous>, transform_indices = @transform_9, window_bounds = array<i64: 4, 32>}, {pipeline_mode = #tpu.pipeline_mode<synchronous>, transform_indices = @transform_10, window_bounds = array<i64: 4, 1>}, {transform_indices = @transform_11, window_bounds = array<i64: 4, 4>}, {transform_indices = @transform_12, window_bounds = array<i64: 1, 4, 256>}]} {
    %c0_i32 = arith.constant 0 : i32
    %0 = arith.cmpi eq, %arg1, %c0_i32 : i32
    %1 = arith.extui %0 : i1 to i32
    %c0_i32_0 = arith.constant 0 : i32
    %2 = arith.cmpi ne, %1, %c0_i32_0 : i32
    scf.if %2 {
      %c0_42 = arith.constant 0 : index
      %c0_43 = arith.constant 0 : index
      %c0_44 = arith.constant 0 : index
      %78 = vector.load %arg2[%c0_42, %c0_43, %c0_44] : memref<1x4x256xf32, #tpu.memory_space<vmem>>, vector<1x4x256xf32>
      %79 = vector.shape_cast %78 : vector<1x4x256xf32> to vector<4x256xf32>
      %c0_45 = arith.constant 0 : index
      %c0_46 = arith.constant 0 : index
      %c0_47 = arith.constant 0 : index
      %80 = vector.load %arg14[%c0_45, %c0_46, %c0_47] : memref<1x4x256xf32, #tpu.memory_space<vmem>>, vector<1x4x256xf32>
      %81 = vector.shape_cast %80 : vector<1x4x256xf32> to vector<4x256xf32>
      %82 = vector.shape_cast %79 : vector<4x256xf32> to vector<1x4x256xf32>
      tpu.vector_store %arg14[%c0_45, %c0_46, %c0_47], %82 {strides = array<i32>} : memref<1x4x256xf32, #tpu.memory_space<vmem>>, vector<1x4x256xf32>,
    } else {
    }
    %c0 = arith.constant 0 : index
    %c0_1 = arith.constant 0 : index
    %c0_2 = arith.constant 0 : index
    %3 = vector.load %arg14[%c0, %c0_1, %c0_2] : memref<1x4x256xf32, #tpu.memory_space<vmem>>, vector<1x4x256xf32>
    %4 = vector.shape_cast %3 : vector<1x4x256xf32> to vector<4x256xf32>
    %c0_3 = arith.constant 0 : index
    %c0_4 = arith.constant 0 : index
    %c0_5 = arith.constant 0 : index
    %5 = vector.load %arg3[%c0_3, %c0_4, %c0_5] : memref<1x8x32xbf16, #tpu.memory_space<vmem>>, vector<1x8x32xbf16>
    %6 = vector.shape_cast %5 : vector<1x8x32xbf16> to vector<8x32xbf16>
    %7 = arith.extf %6 : vector<8x32xbf16> to vector<8x32xf32>
    %c0_6 = arith.constant 0 : index
    %c0_7 = arith.constant 0 : index
    %c0_8 = arith.constant 0 : index
    %8 = vector.load %arg4[%c0_6, %c0_7, %c0_8] : memref<1x32x8xbf16, #tpu.memory_space<vmem>>, vector<1x32x8xbf16>
    %9 = vector.shape_cast %8 : vector<1x32x8xbf16> to vector<32x8xbf16>
    %10 = arith.extf %9 : vector<32x8xbf16> to vector<32x8xf32>
    %c0_9 = arith.constant 0 : index
    %c0_10 = arith.constant 0 : index
    %c0_11 = arith.constant 0 : index
    %11 = vector.load %arg5[%c0_9, %c0_10, %c0_11] : memref<1x32x1xf32, #tpu.memory_space<vmem>>, vector<1x32x1xf32>
    %12 = vector.shape_cast %11 : vector<1x32x1xf32> to vector<32x1xf32>
    %c0_12 = arith.constant 0 : index
    %c0_13 = arith.constant 0 : index
    %13 = vector.load %arg6[%c0_12, %c0_13] : memref<32x4xbf16, #tpu.memory_space<vmem>>, vector<32x4xbf16>
    %14 = arith.extf %13 : vector<32x4xbf16> to vector<32x4xf32>
    %c0_14 = arith.constant 0 : index
    %c0_15 = arith.constant 0 : index
    %15 = vector.load %arg7[%c0_14, %c0_15] : memref<32x32xbf16, #tpu.memory_space<vmem>>, vector<32x32xbf16>
    %16 = arith.extf %15 : vector<32x32xbf16> to vector<32x32xf32>
    %c0_16 = arith.constant 0 : index
    %c0_17 = arith.constant 0 : index
    %17 = vector.load %arg8[%c0_16, %c0_17] : memref<32x32xbf16, #tpu.memory_space<vmem>>, vector<32x32xbf16>
    %18 = arith.extf %17 : vector<32x32xbf16> to vector<32x32xf32>
    %c0_18 = arith.constant 0 : index
    %c0_19 = arith.constant 0 : index
    %19 = vector.load %arg9[%c0_18, %c0_19] : memref<32x32xbf16, #tpu.memory_space<vmem>>, vector<32x32xbf16>
    %20 = arith.extf %19 : vector<32x32xbf16> to vector<32x32xf32>
    %c0_20 = arith.constant 0 : index
    %c0_21 = arith.constant 0 : index
    %21 = vector.load %arg10[%c0_20, %c0_21] : memref<32x32xbf16, #tpu.memory_space<vmem>>, vector<32x32xbf16>
    %22 = arith.extf %21 : vector<32x32xbf16> to vector<32x32xf32>
    %c0_22 = arith.constant 0 : index
    %c0_23 = arith.constant 0 : index
    %23 = vector.load %arg11[%c0_22, %c0_23] : memref<4x32xbf16, #tpu.memory_space<vmem>>, vector<4x32xbf16>
    %24 = arith.extf %23 : vector<4x32xbf16> to vector<4x32xf32>
    %c0_24 = arith.constant 0 : index
    %c0_25 = arith.constant 0 : index
    %25 = vector.load %arg12[%c0_24, %c0_25] : memref<4x1xf32, #tpu.memory_space<vmem>>, vector<4x1xf32>
    %cst = arith.constant dense<0.000000e+00> : vector<32x256xf32>
    %26 = tpu.matmul %14, %4, %cst {dimension_numbers = #tpu.dot_dimension_numbers<[1], [0], [0], [1], [0, 0, 1, 1], [], []>} : vector<32x4xf32>, vector<4x256xf32>, vector<32x256xf32> -> vector<32x256xf32>
    %27 = vector.broadcast %12 : vector<32x1xf32> to vector<32x256xf32>
    %28 = arith.addf %26, %27 : vector<32x256xf32>
    %29 = arith.negf %28 : vector<32x256xf32>
    %30 = math.exp %29 : vector<32x256xf32>
    %cst_26 = arith.constant 1.000000e+00 : f32
    %31 = vector.broadcast %cst_26 : f32 to vector<32x256xf32>
    %32 = arith.addf %31, %30 : vector<32x256xf32>
    %33 = arith.divf %31, %32 : vector<32x256xf32>
    %34 = arith.mulf %28, %33 : vector<32x256xf32>
    %cst_27 = arith.constant dense<0.000000e+00> : vector<32x256xf32>
    %35 = tpu.matmul %16, %34, %cst_27 {dimension_numbers = #tpu.dot_dimension_numbers<[1], [0], [0], [1], [0, 0, 1, 1], [], []>} : vector<32x32xf32>, vector<32x256xf32>, vector<32x256xf32> -> vector<32x256xf32>
    %cst_28 = arith.constant dense<0.000000e+00> : vector<8x32xf32>
    %36 = tpu.matmul %7, %18, %cst_28 {dimension_numbers = #tpu.dot_dimension_numbers<[1], [0], [0], [1], [0, 0, 1, 1], [], []>} : vector<8x32xf32>, vector<32x32xf32>, vector<8x32xf32> -> vector<8x32xf32>
    %cst_29 = arith.constant dense<0.000000e+00> : vector<32x8xf32>
    %37 = tpu.matmul %20, %10, %cst_29 {dimension_numbers = #tpu.dot_dimension_numbers<[1], [0], [0], [1], [0, 0, 1, 1], [], []>} : vector<32x32xf32>, vector<32x8xf32>, vector<32x8xf32> -> vector<32x8xf32>
    %cst_30 = arith.constant dense<0.000000e+00> : vector<8x256xf32>
    %38 = tpu.matmul %36, %35, %cst_30 {dimension_numbers = #tpu.dot_dimension_numbers<[1], [0], [0], [1], [0, 0, 1, 1], [], []>} : vector<8x32xf32>, vector<32x256xf32>, vector<8x256xf32> -> vector<8x256xf32>
    %cst_31 = arith.constant 0.176776692 : f32
    %39 = vector.broadcast %cst_31 : f32 to vector<8x256xf32>
    %40 = arith.mulf %38, %39 : vector<8x256xf32>
    %cst_32 = arith.constant dense<0xFF800000> : vector<256xf32>
    %41 = vector.multi_reduction <maximumf>, %40, %cst_32 [0] : vector<8x256xf32> to vector<256xf32>
    %42 = vector.shape_cast %41 : vector<256xf32> to vector<1x256xf32>
    %43 = vector.broadcast %42 : vector<1x256xf32> to vector<8x256xf32>
    %44 = arith.subf %40, %43 : vector<8x256xf32>
    %45 = math.exp %44 : vector<8x256xf32>
    %cst_33 = arith.constant dense<0.000000e+00> : vector<256xf32>
    %46 = vector.multi_reduction <add>, %45, %cst_33 [0] : vector<8x256xf32> to vector<256xf32>
    %47 = vector.shape_cast %46 : vector<256xf32> to vector<1x256xf32>
    %48 = vector.broadcast %47 : vector<1x256xf32> to vector<8x256xf32>
    %49 = arith.divf %45, %48 : vector<8x256xf32>
    %cst_34 = arith.constant dense<0.000000e+00> : vector<32x256xf32>
    %50 = tpu.matmul %37, %49, %cst_34 {dimension_numbers = #tpu.dot_dimension_numbers<[1], [0], [0], [1], [0, 0, 1, 1], [], []>} : vector<32x8xf32>, vector<8x256xf32>, vector<32x256xf32> -> vector<32x256xf32>
    %cst_35 = arith.constant dense<0.000000e+00> : vector<32x256xf32>
    %51 = tpu.matmul %22, %50, %cst_35 {dimension_numbers = #tpu.dot_dimension_numbers<[1], [0], [0], [1], [0, 0, 1, 1], [], []>} : vector<32x32xf32>, vector<32x256xf32>, vector<32x256xf32> -> vector<32x256xf32>
    %52 = arith.addf %34, %51 : vector<32x256xf32>
    %cst_36 = arith.constant dense<0.000000e+00> : vector<4x256xf32>
    %53 = tpu.matmul %24, %52, %cst_36 {dimension_numbers = #tpu.dot_dimension_numbers<[1], [0], [0], [1], [0, 0, 1, 1], [], []>} : vector<4x32xf32>, vector<32x256xf32>, vector<4x256xf32> -> vector<4x256xf32>
    %54 = vector.broadcast %25 : vector<4x1xf32> to vector<4x256xf32>
    %55 = arith.addf %53, %54 : vector<4x256xf32>
    %56 = arith.index_cast %arg1 : i32 to index
    %c0_37 = arith.constant 0 : index
    %57 = memref.load %arg13[%56, %c0_37] : memref<4x4xf32, #tpu.memory_space<smem>>
    %58 = arith.index_cast %arg1 : i32 to index
    %c1 = arith.constant 1 : index
    %59 = memref.load %arg13[%58, %c1] : memref<4x4xf32, #tpu.memory_space<smem>>
    %60 = arith.index_cast %arg1 : i32 to index
    %c2 = arith.constant 2 : index
    %61 = memref.load %arg13[%60, %c2] : memref<4x4xf32, #tpu.memory_space<smem>>
    %62 = arith.index_cast %arg1 : i32 to index
    %c3 = arith.constant 3 : index
    %63 = memref.load %arg13[%62, %c3] : memref<4x4xf32, #tpu.memory_space<smem>>
    %64 = vector.broadcast %59 : f32 to vector<4x256xf32>
    %65 = arith.mulf %64, %55 : vector<4x256xf32>
    %66 = arith.subf %4, %65 : vector<4x256xf32>
    %cst_38 = arith.constant 1.000000e+00 : f32
    %67 = arith.divf %cst_38, %57 : f32
    %68 = vector.broadcast %67 : f32 to vector<4x256xf32>
    %69 = arith.mulf %66, %68 : vector<4x256xf32>
    %70 = vector.broadcast %61 : f32 to vector<4x256xf32>
    %71 = arith.mulf %70, %69 : vector<4x256xf32>
    %72 = vector.broadcast %63 : f32 to vector<4x256xf32>
    %73 = arith.mulf %72, %55 : vector<4x256xf32>
    %74 = arith.addf %71, %73 : vector<4x256xf32>
    %c0_39 = arith.constant 0 : index
    %c0_40 = arith.constant 0 : index
    %c0_41 = arith.constant 0 : index
    %75 = vector.load %arg14[%c0_39, %c0_40, %c0_41] : memref<1x4x256xf32, #tpu.memory_space<vmem>>, vector<1x4x256xf32>
    %76 = vector.shape_cast %75 : vector<1x4x256xf32> to vector<4x256xf32>
    %77 = vector.shape_cast %74 : vector<4x256xf32> to vector<1x4x256xf32>
    tpu.vector_store %arg14[%c0_39, %c0_40, %c0_41], %77 {strides = array<i32>} : memref<1x4x256xf32, #tpu.memory_space<vmem>>, vector<1x4x256xf32>,
    return
  }
  func.func @transform_0(%arg0: i32, %arg1: i32) -> (i32, i32, i32) {
    %c0_i32 = arith.constant 0 : i32
    %c0_i32_0 = arith.constant 0 : i32
    %c0_i32_1 = arith.constant 0 : i32
    return %arg0, %c0_i32, %c0_i32_0 : i32, i32, i32
  }
  func.func @transform_1(%arg0: i32, %arg1: i32) -> (i32, i32, i32) {
    %c0_i32 = arith.constant 0 : i32
    %c0_i32_0 = arith.constant 0 : i32
    %c0_i32_1 = arith.constant 0 : i32
    return %arg0, %c0_i32, %c0_i32_0 : i32, i32, i32
  }
  func.func @transform_2(%arg0: i32, %arg1: i32) -> (i32, i32, i32) {
    %c0_i32 = arith.constant 0 : i32
    %c0_i32_0 = arith.constant 0 : i32
    %c0_i32_1 = arith.constant 0 : i32
    return %arg0, %c0_i32, %c0_i32_0 : i32, i32, i32
  }
  func.func @transform_3(%arg0: i32, %arg1: i32) -> (i32, i32, i32) {
    %c0_i32 = arith.constant 0 : i32
    %c0_i32_0 = arith.constant 0 : i32
    %c0_i32_1 = arith.constant 0 : i32
    return %arg1, %c0_i32, %c0_i32_0 : i32, i32, i32
  }
  func.func @transform_4(%arg0: i32, %arg1: i32) -> (i32, i32) {
    %c0_i32 = arith.constant 0 : i32
    %c0_i32_0 = arith.constant 0 : i32
    %c0_i32_1 = arith.constant 0 : i32
    return %c0_i32, %c0_i32_0 : i32, i32
  }
  func.func @transform_5(%arg0: i32, %arg1: i32) -> (i32, i32) {
    %c0_i32 = arith.constant 0 : i32
    %c0_i32_0 = arith.constant 0 : i32
    %c0_i32_1 = arith.constant 0 : i32
    return %c0_i32, %c0_i32_0 : i32, i32
  }
  func.func @transform_6(%arg0: i32, %arg1: i32) -> (i32, i32) {
    %c0_i32 = arith.constant 0 : i32
    %c0_i32_0 = arith.constant 0 : i32
    %c0_i32_1 = arith.constant 0 : i32
    return %c0_i32, %c0_i32_0 : i32, i32
  }
  func.func @transform_7(%arg0: i32, %arg1: i32) -> (i32, i32) {
    %c0_i32 = arith.constant 0 : i32
    %c0_i32_0 = arith.constant 0 : i32
    %c0_i32_1 = arith.constant 0 : i32
    return %c0_i32, %c0_i32_0 : i32, i32
  }
  func.func @transform_8(%arg0: i32, %arg1: i32) -> (i32, i32) {
    %c0_i32 = arith.constant 0 : i32
    %c0_i32_0 = arith.constant 0 : i32
    %c0_i32_1 = arith.constant 0 : i32
    return %c0_i32, %c0_i32_0 : i32, i32
  }
  func.func @transform_9(%arg0: i32, %arg1: i32) -> (i32, i32) {
    %c0_i32 = arith.constant 0 : i32
    %c0_i32_0 = arith.constant 0 : i32
    %c0_i32_1 = arith.constant 0 : i32
    return %c0_i32, %c0_i32_0 : i32, i32
  }
  func.func @transform_10(%arg0: i32, %arg1: i32) -> (i32, i32) {
    %c0_i32 = arith.constant 0 : i32
    %c0_i32_0 = arith.constant 0 : i32
    %c0_i32_1 = arith.constant 0 : i32
    return %c0_i32, %c0_i32_0 : i32, i32
  }
  func.func @transform_11(%arg0: i32, %arg1: i32) -> (i32, i32) {
    %c0_i32 = arith.constant 0 : i32
    %c0_i32_0 = arith.constant 0 : i32
    %c0_i32_1 = arith.constant 0 : i32
    return %c0_i32, %c0_i32_0 : i32, i32
  }
  func.func @transform_12(%arg0: i32, %arg1: i32) -> (i32, i32, i32) {
    %c0_i32 = arith.constant 0 : i32
    %c0_i32_0 = arith.constant 0 : i32
    %c0_i32_1 = arith.constant 0 : i32
    return %arg0, %c0_i32, %c0_i32_0 : i32, i32, i32
  }
}

</mosaic_0001>

<bundles_post_ra>
// kernel: dmd_forward.1
= control target key start
LH: loop header
LB: loop body
LE: loop exit
PB: predicated region body
PF: predicated region fallthrough
CT: control target
= control target key end

     0   :  { %s2183_s0 = inlined_call_operand.vmem [shape: f32[2,4,256], index: 0, kind: input, shape index: {}]   ;;  %s2184_s1 = inlined_call_operand.vmem [shape: bf16[2,8,32], index: 1, kind: input, shape index: {}]   ;;  %s2185_s2 = inlined_call_operand.vmem [shape: bf16[2,32,8], index: 2, kind: input, shape index: {}]   ;;  %s2186_s3 = inlined_call_operand.vmem [shape: f32[4,32,1], index: 3, kind: input, shape index: {}]   ;;  %s2187_s4 = inlined_call_operand.vmem [shape: bf16[32,4], index: 4, kind: input, shape index: {}]   ;;  %s2188_s5 = inlined_call_operand.vmem [shape: bf16[32,32], index: 5, kind: input, shape index: {}]   ;;  %s2189_s6 = inlined_call_operand.vmem [shape: bf16[32,32], index: 6, kind: input, shape index: {}]   ;;  %s2190_s7 = inlined_call_operand.vmem [shape: bf16[32,32], index: 7, kind: input, shape index: {}]   ;;  %s2191_s8 = inlined_call_operand.vmem [shape: bf16[32,32], index: 8, kind: input, shape index: {}]   ;;  %s2192_s9 = inlined_call_operand.vmem [shape: bf16[4,32], index: 9, kind: input, shape index: {}]   ;;  %s2193_s10 = inlined_call_operand.vmem [shape: f32[4,1], index: 10, kind: input, shape index: {}]   ;;  %s2194_s11 = inlined_call_operand.vmem [shape: f32[4,4], index: 11, kind: input, shape index: {}]   ;;  %s2195_s12 = inlined_call_operand.vmem [shape: f32[2,4,256], index: 12, kind: output, shape index: {}]  }
   0x1   :  { %2199 = sst [smem:[#allocation10_spill]] %s2192_s9 }
   0x2   :  { %2200 = sst [smem:[#allocation11_spill]] %s2193_s10 }
   0x3   :  { %2201 = sst [smem:[#allocation12_spill]] %s2194_s11 }
   0x4   :  { %17 = vsyncpa [#allocation3], 0  ;;  %s1775_s21 = smov 0   ;;  %s1777_s22 = smov 0  }
   0x5   :  { %s1779_s23 = smov 0   ;;  %s1781_s24 = smov 0  }
   0x6   :  { %s1783_s25 = smov 0  }
   0x7 LB: > { %2202 = sst [smem:[#allocation5_spill]] %s1698_s23  ;;  %s1420_s26 = sadd.s32 4294967295, %s1706_s25   ;;  %s1706_s25 = sphi %s1783_s25, %s23_s25   ;;  %s1702_s24 = sphi %s1781_s24, %s2230_s24   ;;  %s1698_s23 = sphi %s1779_s23, %s2229_s23   ;;  %s1694_s22 = sphi %s1777_s22, %s2228_s22   ;;  %s1690_s21 = sphi %s1775_s21, %s2227_s21  }
   0x8   : > { %2203 = sst [smem:[#allocation6_spill]] %s1702_s24  ;;  %s32_s27 = sadd.s32 1, %s1698_s23 }
   0x9   : > { %2204 = sst [smem:[#allocation7_spill]] %s1706_s25  ;;  %p33_p0 = scmp.ge.s32.totalorder %s32_s27, 4 }
   0xa   : > { %s35_s28 = sadd.s32 1, %s1702_s24  ;;  %p1422_p1 = scmp.ge.s32.totalorder %s1706_s25, 1 }
   0xb   : > { %p338_p2 = scmp.lt.s32.totalorder %s1706_s25, 9  ;;  %s2232_s27 = smov (%p33_p0, %s32_s27), 0 }
   0xc   : > { %2205 = sst [smem:[#allocation8_spill]] %s2232_s27  ;;  %s2234_s28 = smov (!%p33_p0, %s35_s28), %s1702_s24 }
   0xd   : > { %p339_p3 = pnand %p1422_p1, %p338_p2  ;;  %p37_p4 = scmp.ge.s32.totalorder %s2234_s28, 2 }
   0xe   : > { %p1560_p5 = scmp.eq.s32.totalorder %s1420_s26, 0  ;;  %s2206_s11 = sld [smem:[#allocation12_spill]] }
   0xf   : > { %p1556_p6 = pneg %p339_p3  ;;  %s2236_s28 = smov (%p37_p4, %s2234_s28), 0 }
  0x10   : > { %2207 = sst [smem:[#allocation9_spill]] %s2236_s28  ;;  %s1708_s14 = smov [#allocation2]  }
  0x11   : > { %p1557_p7 = pnand %p1560_p5, %p1556_p6  ;;  %415 = sbr.rel (%p339_p3) target bundleno = 1059 (0x423), region = 68 }
  0x14   : > { %s371_s13 = sshll.u32 %s2206_s11, 4  ;;  %s372_s13 = int_to_ptr.vmem [resolvable:$true] %s371_s13 }
  0x15   : > { %1559 = dma.vmem_to_smem (!%p1557_p7), %s372_s13, 64, %s1708_s14, [#allocation3]  }
  0x16   : > { %1685 = dma.done.wait (%p1560_p5), [#allocation3], 64  }
  0x17   : > { %1687 = vsyncadd (%p1560_p5), [#allocation3], 4294967232 }
  0x18   : > { %422 = sfence }
  0x19   : > { %p473_p8 = scmp.lt.s32.totalorder %s1694_s22, 1  ;;  %p487_p9 = scmp.lt.s32.totalorder %s1690_s21, 3 }
  0x1a   : > { %p1436_p10 = scmp.ne.s32.totalorder %s1690_s21, 0 }
  0x1b   : > { %s2238_s22 = smov (!%p473_p8, %s1694_s22), 1 }
  0x1c   : > { %s488_s15 = scalar_select %p487_p9, %s1690_s21, 3 }
  0x1d   : > { %s1491_s16 = sshll.u32 %s2238_s22, 3  ;;  %s1429_s17 = sshll.u32 %s2238_s22, 2 }
  0x1e   : > { %s477_s20 = scalar_lea.vmem %s2183_s0, %s1491_s16  ;;  %s1819_s30 = scalar_lea.vmem %s2184_s1, %s1429_s17 }
  0x1f   : > { %s1492_s13 = sshll.u32 %s2238_s22, 4  ;;  %s1493_s14 = sshll.u32 %s488_s15, 5 }
  0x20   : > { %s1824_s27 = scalar_lea.vmem %s2185_s2, %s1492_s13  ;;  %s491_s25 = scalar_lea.vmem %s2186_s3, %s1493_s14 }
  0x21   : > { %s1832_s18 = scalar_lea.vmem %s2195_s12, %s1491_s16  ;;  %500 = sbr.rel (%p1436_p10) target bundleno = 40 (0x28), region = 76 }
  0x26   : > { %v501_v0 = vld [vmem:[%s477_s20] sm:$0xff] }
  0x27   : > { %502 = vst [vmem:[%s1832_s18] sm:$0xff] %v501_v0 }
  0x28 PF: > { %v1709_v2 = vmov 0   ;;  %v515_v3 = vld [vmem:[%s491_s25 + $0x8] sm:$0xff]  ;;  %v517_v4 = vld [vmem:[%s491_s25 + $0x18] sm:$0xff]  ;;  %v1504_v5 = vld [vmem:[%s2187_s4] sm:$0xff]   ;;  %vm598_vm0 = vcmask 1043456   ;;  %vm585_vm1 = vcmask 31744  }
  0x29   : > { %1605 = vset.pattern.permute.xlu1 %v1709_v2  ;;  %1604 = vset.pattern.permute.xlu0 %v1709_v2  ;;  %v1544_v6 = vld [vmem:[%s2187_s4 + $0x8] sm:$0xff]   ;;  %v1505_v7 = vunpack.c.l.bf16 %v1504_v5  ;;  %v514_v11 = vld [vmem:[%s491_s25] sm:$0xff]  ;;  %v516_v12 = vld [vmem:[%s491_s25 + $0x10] sm:$0xff]  ;;  %v1506_v13 = vunpack.c.h.bf16 %v1504_v5  ;;  %s2142_s10 = sshll.u32 %s1690_s21, 7  ;;  %s2224_s24 = sld [smem:[#allocation11_spill]] }
  0x2a   : > { %568 = vperm.xlu1 %1605, %v515_v3   ;;  %578 = vperm.xlu0 %1604, %v517_v4   ;;  %v1510_v8 = vunpack.c.h.bf16 %v1544_v6  ;;  %v1509_v14 = vunpack.c.l.bf16 %v1544_v6  ;;  %s1259_s11 = sld [smem:[#allocation2 + %s2142_s10]]  ;;  %s1260_s15 = sadd.s32 1, %s2142_s10 }
  0x2b   : > { %1606 = vset.pattern.permute.xlu2 %v1709_v2  ;;  %s2225_s28 = sld [smem:[#allocation10_spill]]  ;;  %s1264_s16 = sadd.s32 3, %s2142_s10 }
  0x2c   : > { %s1261_s17 = sld [smem:[#allocation2 + %s1260_s15]]  ;;  %s1262_s20 = sadd.s32 2, %s2142_s10 }
  0x2d   : > { %s1265_s19 = sld [smem:[#allocation2 + %s1264_s16]] }
  0x2e   : > { %v1837_v1 = vld [vmem:[%s1832_s18] sm:$0xff]  ;;  %s1263_s26 = sld [smem:[#allocation2 + %s1262_s20]] }
  0x2f   : > { %582 = vst [vmem:[#allocation1] ss:$2 sm:$0xff] %v1837_v1 }
  0x32   : > { %563 = vperm.xlu1 %1605, %v514_v11   ;;  %573 = vperm.xlu0 %1604, %v516_v12   ;;  %v1916_v11 = vld [vmem:[%s2188_s5] sm:$0xff]  }
  0x36   : > { %v583_v9 = vld.sshfl [vmem:[#allocation1] sm:$0xff pattern:$0x75316420]  ;;  %v584_v10 = vld.sshfl [vmem:[#allocation1 + $0x8] sm:$0xff pattern:$0x75316420] }
  0x37   : > { %1437 = vmatpush.msk.msra.mxu0 %vm598_vm0, %v583_v9  ;;  %1442 = vmatpush.msk.msra.mxu1 %vm598_vm0, %v584_v10 }
  0x38   : > { %1549 = vmatpush.msk.msra.mxu3 %vm598_vm0, %v584_v10  ;;  %1438 = vmatmul.msk.f32.vlgmr.msra.gmra.mxu0 %vm585_vm1, %v1505_v7 }
  0x39   : > { %1443 = vmatmul.msk.f32.vlgmr.msra.gmra.mxu1 %vm585_vm1, %v1505_v7  ;;  %1446 = vmatmul.msk.f32.vlgmr.msra.gmra.mxu3 %vm585_vm1, %v1510_v8 }
  0x40   : > { %1439 = vmatmul.msk.f32.gmra.mxu0 %vm585_vm1, %v1506_v13 }
  0x41   : > { %1444 = vmatmul.msk.f32.gmra.mxu1 %vm585_vm1, %v1506_v13 }
  0x48   : > { %1440 = vmatmul.msk.f32.gmra.mxu0 %vm585_vm1, %v1509_v14 }
  0x49   : > { %1445 = vmatmul.msk.f32.gmra.mxu1 %vm585_vm1, %v1509_v14 }
  0x50   : > { %1441 = vmatmul.msk.f32.gmra.mxu0 %vm585_vm1, %v1510_v8 }
  0x9c   : > { %v569_v15 = vpop.permute.xlu1 %568  ;;  %v579_v21 = vpop.permute.xlu0 %578 }
  0xa4   : > { %v564_v16 = vpop.permute.xlu1 %563  ;;  %v574_v35 = vpop.permute.xlu0 %573 }
  0xb5   : > { %v620_v17 = vpop.f32.mrf.mxu0 }
  0xb6   : > { %v649_v18 = vpop.f32.mrf.mxu1  ;;  %v1862_v25 = vadd.f32 %v620_v17, %v564_v16 }
  0xb7   : > { %v1857_v19 = vadd.f32 %v649_v18, %v564_v16 }
  0xb8   : > { %v1447_v33 = vmul.f32 -1.442695, %v1862_v25 }
  0xb9   : > { %v1448_v20 = vmul.f32 -1.442695, %v1857_v19 }
  0xbb   : > { %1607 = vpow2.f32 %v1448_v20 }
  0xbc   : > { %v658_v22 = vpop.f32.mrf.mxu3 }
  0xbd   : > { %v1860_v23 = vadd.f32 %v658_v22, %v579_v21  ;;  %v623_v24 = vpop.f32.mrf.mxu0 }
  0xbe   : > { %v1864_v26 = vadd.f32 %v623_v24, %v569_v15  ;;  %v652_v27 = vpop.f32.mrf.mxu1 }
  0xbf   : > { %v1454_v28 = vmul.f32 -1.442695, %v1860_v23  ;;  %v1867_v29 = vadd.f32 %v652_v27, %v569_v15  ;;  %v1513_v27 = vunpack.c.l.bf16 %v1916_v11 }
  0xc0   : > { %v1449_v30 = vmul.f32 -1.442695, %v1864_v26 }
  0xc1   : > { %v1608_v31 = vpop.eup %1607  ;;  %1609 = vpow2.f32 %v1454_v28  ;;  %v1450_v32 = vmul.f32 -1.442695, %v1867_v29 }
  0xc2   : > { %v1872_v34 = vadd.f32 1.0, %v1608_v31  ;;  %1611 = vpow2.f32 %v1449_v30 }
  0xc3   : > { %1613 = vpow2.f32 %v1450_v32 }
  0xc4   : > { %1615 = vpow2.f32 %v1447_v33  ;;  %v719_v61 = vand.u32 2147483648, %v1872_v34  ;;  %vm713_vm4 = vweird.f32 %v1872_v34  ;;  %v717_v15 = vand.u32 2147483647, %v1872_v34 }
  0xc5   : > { %v626_v36 = vpop.f32.mrf.mxu0  ;;  %1617 = vrcp.f32 %v1872_v34 }
  0xc6   : > { %v1874_v37 = vadd.f32 %v626_v36, %v574_v35  ;;  %v655_v38 = vpop.f32.mrf.mxu1  ;;  %v1920_v16 = vor.u32 1.1754944e-38, %v719_v61  ;;  %vm1955_vm10 = vcmp.eq.f32.partialorder %v717_v15, 8.507059e+37 }
  0xc7   : > { %v1610_v39 = vpop.eup %1609  ;;  %v1877_v40 = vadd.f32 %v655_v38, %v574_v35 }
  0xc8   : > { %v692_v41 = vadd.f32 1.0, %v1610_v39  ;;  %v1451_v42 = vmul.f32 -1.442695, %v1874_v37  ;;  %v1612_v43 = vpop.eup %1611 }
  0xc9   : > { %v1452_v44 = vmul.f32 -1.442695, %v1877_v40  ;;  %v1614_v45 = vpop.eup %1613  ;;  %v1881_v47 = vadd.f32 1.0, %v1612_v43 }
  0xca   : > { %1619 = vrcp.f32 %v692_v41  ;;  %v1616_v46 = vpop.eup %1615  ;;  %v1883_v48 = vadd.f32 1.0, %v1614_v45  ;;  %v807_v0 = vand.u32 2147483647, %v692_v41  ;;  %v809_v2 = vand.u32 2147483648, %v692_v41 }
  0xcb   : > { %1621 = vpow2.f32 %v1451_v42  ;;  %v1885_v49 = vpop.eup %1617  ;;  %v1890_v52 = vadd.f32 1.0, %v1616_v46  ;;  %vm803_vm3 = vweird.f32 %v692_v41  ;;  %v734_v42 = vand.u32 2147483648, %v1881_v47 }
  0xcc   : > { %1623 = vpow2.f32 %v1452_v44  ;;  %v709_v55 = vmul.f32 %v1885_v49, %v1872_v34  ;;  %v810_v13 = vor.u32 1.1754944e-38, %v809_v2  ;;  %vm808_vm6 = vcmp.eq.f32.partialorder %v807_v0, 8.507059e+37 }
  0xcd   : > { %v629_v50 = vpop.f32.mrf.mxu0  ;;  %1625 = vrcp.f32 %v1883_v48  ;;  %v702_v7 = vand.u32 2147483647, %v1890_v52  ;;  %v704_v8 = vand.u32 2147483648, %v1890_v52  ;;  %v747_v24 = vand.u32 2147483647, %v1883_v48 }
  0xce   : > { %v1888_v51 = vadd.f32 %v629_v50, %v579_v21  ;;  %1627 = vrcp.f32 %v1881_v47  ;;  %v710_v3 = vsub.f32 1.0, %v709_v55  ;;  %vm714_vm7 = vweird.f32 %v1885_v49 }
  0xcf   : > { %v749_v32 = vand.u32 2147483648, %v1883_v48  ;;  %vm743_vm8 = vweird.f32 %v1883_v48  ;;  %vm1951_vm9 = vcmp.eq.f32.partialorder %v747_v24, 8.507059e+37  ;;  %vm1965_vm12 = vmor %vm713_vm4, %vm714_vm7  ;;  %vm728_vm13 = vweird.f32 %v1881_v47 }
  0xd0   : > { %v1620_v53 = vpop.eup %1619  ;;  %v1453_v54 = vmul.f32 -1.442695, %v1888_v51  ;;  %v711_v14 = vmul.f32 %v1885_v49, %v710_v3 }
  0xd1   : > { %v799_v56 = vmul.f32 %v1620_v53, %v692_v41  ;;  %v1622_v57 = vpop.eup %1621  ;;  %vm804_vm2 = vweird.f32 %v1620_v53  ;;  %v732_v41 = vand.u32 2147483647, %v1881_v47  ;;  %v750_v55 = vor.u32 1.1754944e-38, %v749_v32 }
  0xd2   : > { %1629 = vpow2.f32 %v1453_v54  ;;  %v1624_v58 = vpop.eup %1623  ;;  %v1897_v59 = vadd.f32 1.0, %v1622_v57  ;;  %vm805_vm5 = vmor %vm803_vm3, %vm804_vm2  ;;  %v712_v35 = vadd.f32 %v1885_v49, %v711_v14 }
  0xd3   : > { %1631 = vrcp.f32 %v1890_v52  ;;  %v800_v60 = vsub.f32 1.0, %v799_v56  ;;  %v1900_v62 = vpop.eup %1625  ;;  %v1902_v63 = vadd.f32 1.0, %v1624_v58  ;;  %v504_v56 = vld [vmem:[%s1819_s30] sm:$0xf] }
  0xd4   : > { %1633 = vrcp.f32 %v1897_v59  ;;  %v739_v5 = vmul.f32 %v1900_v62, %v1883_v48  ;;  %v1907_v6 = vpop.eup %1627  ;;  %vm744_vm11 = vweird.f32 %v1900_v62  ;;  %v716_v57 = vsel %vm1965_vm12, %v1885_v49, %v712_v35 }
  0xd5   : > { %v801_v4 = vmul.f32 %v1620_v53, %v800_v60  ;;  %1635 = vrcp.f32 %v1902_v63  ;;  %v724_v21 = vmul.f32 %v1907_v6, %v1881_v47  ;;  %v777_v43 = vand.u32 2147483647, %v1902_v63  ;;  %vm1986_vm4 = vmor %vm743_vm8, %vm744_vm11 }
  0xd6   : > { %v740_v10 = vsub.f32 1.0, %v739_v5  ;;  %v779_v44 = vand.u32 2147483648, %v1902_v63  ;;  %vm729_vm14 = vweird.f32 %v1907_v6  ;;  %vm773_vm1 = vweird.f32 %v1902_v63 }
  0xd7   : > { %v802_v9 = vadd.f32 %v1620_v53, %v801_v4  ;;  %v725_v39 = vsub.f32 1.0, %v724_v21  ;;  %vm1978_vm3 = vcmp.eq.f32.partialorder %v777_v43, 8.507059e+37 }
  0xd8   : > { %v1630_v12 = vpop.eup %1629  ;;  %v741_v31 = vmul.f32 %v1900_v62, %v740_v10  ;;  %v780_v3 = vor.u32 1.1754944e-38, %v779_v44  ;;  %v764_v10 = vand.u32 2147483648, %v1897_v59 }
  0xd9   : > { %v1922_v17 = vpop.eup %1631  ;;  %v1924_v18 = vadd.f32 1.0, %v1630_v12  ;;  %v806_v20 = vsel %vm805_vm5, %v1620_v53, %v802_v9  ;;  %v726_v34 = vmul.f32 %v1907_v6, %v725_v39  ;;  %vm758_vm5 = vweird.f32 %v1897_v59 }
  0xda   : > { %v811_v22 = vsel %vm808_vm6, %v810_v13, %v806_v20  ;;  %v1931_v28 = vpop.eup %1633  ;;  %v694_v38 = vmul.f32 %v1922_v17, %v1890_v52  ;;  %v742_v54 = vadd.f32 %v1900_v62, %v741_v31  ;;  %vm699_vm15 = vweird.f32 %v1922_v17  ;;  %v1546_v31 = vld [vmem:[%s2189_s6 + $0x8] sm:$0xff]  }
  0xdb   : > { %1637 = vrcp.f32 %v1924_v18  ;;  %v1935_v30 = vmul.f32 %v811_v22, %v1860_v23  ;;  %v1636_v33 = vpop.eup %1635  ;;  %v754_v36 = vmul.f32 %v1931_v28, %v1897_v59  ;;  %vm698_vm6 = vweird.f32 %v1890_v52 }
  0xdc   : > { %v769_v23 = vmul.f32 %v1636_v33, %v1902_v63  ;;  %v695_v60 = vsub.f32 1.0, %v694_v38  ;;  %vm774_vm2 = vweird.f32 %v1636_v33  ;;  %v746_v5 = vsel %vm1986_vm4, %v1900_v62, %v742_v54 }
  0xdd   : > { %875 = vmatpush.msrb.mxu3 %v1935_v30  ;;  %v755_v50 = vsub.f32 1.0, %v754_v36  ;;  %v762_v9 = vand.u32 2147483647, %v1897_v59  ;;  %vm775_vm7 = vmor %vm773_vm1, %vm774_vm2  ;;  %vm759_vm8 = vweird.f32 %v1931_v28  ;;  %v792_v15 = vand.u32 2147483647, %v1924_v18 }
  0xde   : > { %v770_v53 = vsub.f32 1.0, %v769_v23  ;;  %v696_v13 = vmul.f32 %v1922_v17, %v695_v60  ;;  %v794_v20 = vand.u32 2147483648, %v1924_v18  ;;  %v727_v21 = vadd.f32 %v1907_v6, %v726_v34  ;;  %vm2019_vm12 = vmor %vm758_vm5, %vm759_vm8  ;;  %v1496_v60 = vld [vmem:[%s1824_s27] sm:$0xff]  }
  0xdf   : > { %v756_v58 = vmul.f32 %v1931_v28, %v755_v50  ;;  %v751_v22 = vsel %vm1951_vm9, %v750_v55, %v746_v5  ;;  %v1526_v36 = vunpack.c.h.bf16 %v1546_v31  ;;  %v1525_v38 = vunpack.c.l.bf16 %v1546_v31  ;;  %v1520_v55 = vld [vmem:[%s2189_s6] sm:$0xff]  }
  0xe0   : > { %v771_v0 = vmul.f32 %v1636_v33, %v770_v53  ;;  %vm788_vm9 = vweird.f32 %v1924_v18  ;;  %v697_v59 = vadd.f32 %v1922_v17, %v696_v13  ;;  %v2038_v39 = vmul.f32 %v751_v22, %v1867_v29 }
  0xe1   : > { %v1638_v61 = vpop.eup %1637  ;;  %v757_v12 = vadd.f32 %v1931_v28, %v756_v58  ;;  %vm821_vm1 = vcmask 261120   ;;  %907 = vmatpush.msrb.mxu0 %v1526_v36  ;;  %vm763_vm4 = vcmp.eq.f32.partialorder %v762_v9, 8.507059e+37  ;;  %v735_v50 = vor.u32 1.1754944e-38, %v734_v42 }
  0xe2   : > { %v784_v4 = vmul.f32 %v1638_v61, %v1924_v18  ;;  %v772_v63 = vadd.f32 %v1636_v33, %v771_v0  ;;  %vm789_vm11 = vweird.f32 %v1638_v61  ;;  %v795_v18 = vor.u32 1.1754944e-38, %v794_v20 }
  0xe3   : > { %vm790_vm2 = vmor %vm788_vm9, %vm789_vm11  ;;  %908 = vmatpush.msrb.mxu0 %v1525_v38  ;;  %v705_v54 = vor.u32 1.1754944e-38, %v704_v8  ;;  %v1514_v58 = vunpack.c.h.bf16 %v1916_v11  ;;  %v1498_v2 = vunpack.c.h.bf16 %v1496_v60  ;;  %v1497_v49 = vunpack.c.l.bf16 %v1496_v60 }
  0xe4   : > { %v785_v48 = vsub.f32 1.0, %v784_v4  ;;  %v776_v14 = vsel %vm775_vm7, %v1636_v33, %v772_v63  ;;  %v721_v33 = vsel %vm1955_vm10, %v1920_v16, %v716_v57  ;;  %vm2031_vm10 = vmor %vm728_vm13, %vm729_vm14  ;;  %vm733_vm14 = vcmp.eq.f32.partialorder %v732_v41, 8.507059e+37 }
  0xe5   : > { %v781_v62 = vsel %vm1978_vm3, %v780_v3, %v776_v14  ;;  %vm793_vm3 = vcmp.eq.f32.partialorder %v792_v15, 8.507059e+37  ;;  %v731_v44 = vsel %vm2031_vm10, %v1907_v6, %v727_v21  ;;  %v2046_v45 = vmul.f32 %v721_v33, %v1857_v19  ;;  %vm2054_vm13 = vmor %vm698_vm6, %vm699_vm15  ;;  %v1528_v3 = vld [vmem:[%s2190_s7] sm:$0xff]  }
  0xe6   : > { %v786_v24 = vmul.f32 %v1638_v61, %v785_v48  ;;  %v2012_v32 = vmul.f32 %v781_v62, %v1877_v40  ;;  %v761_v40 = vsel %vm2019_vm12, %v1931_v28, %v757_v12  ;;  %v765_v28 = vor.u32 1.1754944e-38, %v764_v10  ;;  %v1547_v12 = vld [vmem:[%s2190_s7 + $0x8] sm:$0xff]  }
  0xe7   : > { %v701_v19 = vsel %vm2054_vm13, %v1922_v17, %v697_v59  ;;  %v736_v42 = vsel %vm733_vm14, %v735_v50, %v731_v44  ;;  %vm703_vm15 = vcmp.eq.f32.partialorder %v702_v7, 8.507059e+37  ;;  %v1521_v17 = vunpack.c.l.bf16 %v1520_v55 }
  0xe8   : > { %v787_v23 = vadd.f32 %v1638_v61, %v786_v24  ;;  %876 = vmatpush.msrb.mxu3 %v2012_v32  ;;  %v766_v46 = vsel %vm763_vm4, %v765_v28, %v761_v40  ;;  %v706_v8 = vsel %vm703_vm15, %v705_v54, %v701_v19  ;;  %v505_v41 = vunpack.c.l.bf16 %v504_v56 }
  0xe9   : > { %v2078_v47 = vmul.f32 %v766_v46, %v1874_v37  ;;  %v2084_v57 = vmul.f32 %v736_v42, %v1864_v26  ;;  %v2089_v37 = vmul.f32 %v706_v8, %v1862_v25  ;;  %v1545_v26 = vld [vmem:[%s2188_s5 + $0x8] sm:$0xff]   ;;  %v1529_v4 = vunpack.c.l.bf16 %v1528_v3 }
  0xea   : > { %v791_v43 = vsel %vm790_vm2, %v1638_v61, %v787_v23  ;;  %877 = vmatpush.msrb.mxu3 %v2038_v39  ;;  %v1517_v52 = vunpack.c.l.bf16 %v1545_v26  ;;  %v1518_v25 = vunpack.c.h.bf16 %v1545_v26  ;;  %v1530_v9 = vunpack.c.h.bf16 %v1528_v3 }
  0xeb   : > { %v796_v29 = vsel %vm793_vm3, %v795_v18, %v791_v43  ;;  %v1533_v14 = vunpack.c.l.bf16 %v1547_v12  ;;  %v1534_v20 = vunpack.c.h.bf16 %v1547_v12  ;;  %vm1061_vm11 = vcmask 64512  }
  0xec   : > { %v2059_v6 = vmul.f32 %v796_v29, %v1888_v51  ;;  %878 = vmatpush.msrb.mxu3 %v2046_v45  ;;  %v1522_v51 = vunpack.c.h.bf16 %v1520_v55 }
  0xed   : > { %1459 = vmatmul.msk.f32.vlgmr.msrb.gmra.mxu3 %vm821_vm1, %v1513_v27 }
  0xee   : > { %846 = vmatpush.msra.mxu2 %v2059_v6  ;;  %909 = vmatpush.msrb.mxu0 %v1522_v51 }
  0xf0   : > { %847 = vmatpush.msra.mxu2 %v2078_v47  ;;  %910 = vmatpush.msrb.mxu0 %v1521_v17 }
  0xf1   : > { %1463 = vmatmul.msk.f32.vlgmr.msrb.gmra.mxu0 %vm821_vm1, %v505_v41 }
  0xf2   : > { %848 = vmatpush.msra.mxu2 %v2084_v57 }
  0xf4   : > { %849 = vmatpush.msra.mxu2 %v2089_v37 }
  0xf5   : > { %1455 = vmatmul.msk.f32.vlgmr.msra.gmra.mxu2 %vm821_vm1, %v1513_v27  ;;  %1460 = vmatmul.msk.f32.gmra.mxu3 %vm821_vm1, %v1514_v58  ;;  %v1543_v27 = vld [vmem:[%s1824_s27 + $0x8] sm:$0xff]  }
  0xf6   : > { %v1502_v0 = vunpack.c.h.bf16 %v1543_v27  ;;  %v1501_v34 = vunpack.c.l.bf16 %v1543_v27 }
  0xf8   : > { %939 = vmatpush.msrb.mxu1 %v1502_v0 }
  0xfa   : > { %940 = vmatpush.msrb.mxu1 %v1501_v34 }
  0xfc   : > { %941 = vmatpush.msrb.mxu1 %v1498_v2 }
  0xfd   : > { %1456 = vmatmul.msk.f32.gmra.mxu2 %vm821_vm1, %v1514_v58  ;;  %1461 = vmatmul.msk.f32.gmra.mxu3 %vm821_vm1, %v1517_v52 }
  0xfe   : > { %942 = vmatpush.msrb.mxu1 %v1497_v49 }
  0xff   : > { %1464 = vmatmul.msk.f32.vlgmr.msrb.gmra.mxu1 %vm821_vm1, %v1529_v4 }
 0x105   : > { %1457 = vmatmul.msk.f32.gmra.mxu2 %vm821_vm1, %v1517_v52  ;;  %1462 = vmatmul.msk.f32.gmra.mxu3 %vm821_vm1, %v1518_v25 }
 0x107   : > { %1465 = vmatmul.msk.f32.gmra.mxu1 %vm821_vm1, %v1530_v9 }
 0x10d   : > { %1458 = vmatmul.msk.f32.gmra.mxu2 %vm821_vm1, %v1518_v25 }
 0x10f   : > { %1466 = vmatmul.msk.f32.gmra.mxu1 %vm821_vm1, %v1533_v14 }
 0x117   : > { %1467 = vmatmul.msk.f32.gmra.mxu1 %vm821_vm1, %v1534_v20 }
 0x16e   : > { %v912_v13 = vpop.f32.mrf.mxu0 }
 0x170   : > { %v880_v7 = vpop.f32.mrf.mxu3 }
 0x178   : > { %v851_v11 = vpop.f32.mrf.mxu2  ;;  %v883_v61 = vpop.f32.mrf.mxu3 }
 0x180   : > { %v854_v63 = vpop.f32.mrf.mxu2  ;;  %v886_v5 = vpop.f32.mrf.mxu3 }
 0x188   : > { %v857_v10 = vpop.f32.mrf.mxu2  ;;  %v889_v48 = vpop.f32.mrf.mxu3 }
 0x189   : > { %991 = vmatpush.msra.mxu3 %v889_v48 }
 0x18b   : > { %992 = vmatpush.msra.mxu3 %v886_v5 }
 0x18d   : > { %993 = vmatpush.msra.mxu3 %v883_v61  ;;  %v944_v61 = vpop.f32.mrf.mxu1 }
 0x18f   : > { %994 = vmatpush.msra.mxu3 %v880_v7 }
 0x190   : > { %v860_v15 = vpop.f32.mrf.mxu2  ;;  %1469 = vmatmul.msk.f32.vlgmr.msra.gmra.mxu3 %vm821_vm1, %v912_v13 }
 0x191   : > { %971 = vmatpush.msrb.mxu2 %v860_v15 }
 0x193   : > { %972 = vmatpush.msrb.mxu2 %v857_v10 }
 0x195   : > { %973 = vmatpush.msrb.mxu2 %v854_v63  ;;  %v947_v15 = vpop.f32.mrf.mxu1 }
 0x197   : > { %974 = vmatpush.msrb.mxu2 %v851_v11 }
 0x198   : > { %1468 = vmatmul.msk.f32.vlgmr.msrb.gmra.mxu2 %vm821_vm1, %v912_v13 }
 0x213   : > { %v996_v21 = vpop.f32.mrf.mxu3 }
 0x214   : > { %v1000_v62 = vmul.f32 0.17677669, %v996_v21 }
 0x216   : > { %v1007_v22 = vrot.slane %v1000_v62, 4 }
 0x218   : > { %v1008_v24 = vmax.f32 %v1000_v62, %v1007_v22 }
 0x21a   : > { %v1009_v31 = vrot.slane %v1008_v24, 2 }
 0x21b   : > { %v976_v33 = vpop.f32.mrf.mxu2 }
 0x21c   : > { %v999_v35 = vmul.f32 0.17677669, %v976_v33  ;;  %v1010_v36 = vmax.f32 %v1008_v24, %v1009_v31  ;;  %v950_v24 = vpop.f32.mrf.mxu1 }
 0x21e   : > { %v1001_v38 = vrot.slane %v999_v35, 4  ;;  %v1011_v23 = vrot.slane %v1010_v36, 1 }
 0x220   : > { %v1002_v40 = vmax.f32 %v999_v35, %v1001_v38  ;;  %v1012_v16 = vmax.f32 %v1010_v36, %v1011_v23 }
 0x222   : > { %v1003_v59 = vrot.slane %v1002_v40, 2  ;;  %v1014_v18 = vsub.f32 %v1000_v62, %v1012_v16 }
 0x224   : > { %v1004_v28 = vmax.f32 %v1002_v40, %v1003_v59  ;;  %v1017_v43 = vmul.f32 1.442695, %v1014_v18  ;;  %v953_v31 = vpop.f32.mrf.mxu1  ;;  %v1536_v18 = vld [vmem:[%s2191_s8] sm:$0xff]  }
 0x226   : > { %v1005_v44 = vrot.slane %v1004_v28, 1  ;;  %1639 = vpow2.f32 %v1017_v43  ;;  %v1538_v43 = vunpack.c.h.bf16 %v1536_v18 }
 0x228   : > { %v1006_v29 = vmax.f32 %v1004_v28, %v1005_v44  ;;  %v1537_v28 = vunpack.c.l.bf16 %v1536_v18  ;;  %v1548_v44 = vld [vmem:[%s2191_s8 + $0x8] sm:$0xff]  }
 0x22a   : > { %v1013_v46 = vsub.f32 %v999_v35, %v1006_v29  ;;  %v1541_v29 = vunpack.c.l.bf16 %v1548_v44 }
 0x22c   : > { %v1015_v50 = vmul.f32 1.442695, %v1013_v46  ;;  %v1640_v53 = vpop.eup %1639  ;;  %v1542_v46 = vunpack.c.h.bf16 %v1548_v44 }
 0x22d   : > { %v1025_v19 = vrot.slane %v1640_v53, 4 }
 0x22e   : > { %1641 = vpow2.f32 %v1015_v50 }
 0x22f   : > { %v1026_v42 = vadd.f32 %v1640_v53, %v1025_v19 }
 0x231   : > { %v1027_v54 = vrot.slane %v1026_v42, 2 }
 0x233   : > { %v1028_v56 = vadd.f32 %v1027_v54, %v1026_v42  ;;  %v560_v42 = vld [vmem:[%s2224_s24] sm:$0xf]  ;;  %v1275_v54 = vstv %s1259_s11 }
 0x234   : > { %v1642_v55 = vpop.eup %1641  ;;  %1212 = vperm.xlu2 %1606, %v560_v42   ;;  %vm1281_vm3 = vweird.f32 %v1275_v54 }
 0x235   : > { %v1019_v51 = vrot.slane %v1642_v55, 4  ;;  %v1029_v17 = vrot.slane %v1028_v56, 1 }
 0x237   : > { %v1020_v8 = vadd.f32 %v1642_v55, %v1019_v51  ;;  %v1030_v41 = vadd.f32 %v1029_v17, %v1028_v56 }
 0x239   : > { %v1021_v58 = vrot.slane %v1020_v8, 2  ;;  %1643 = vrcp.f32 %v1030_v41  ;;  %v1057_v60 = vand.u32 2147483648, %v1030_v41  ;;  %v1055_v34 = vand.u32 2147483647, %v1030_v41 }
 0x23a   : > { %vm1051_vm6 = vweird.f32 %v1030_v41 }
 0x23b   : > { %v1022_v26 = vadd.f32 %v1021_v58, %v1020_v8  ;;  %v1058_v49 = vor.u32 1.1754944e-38, %v1057_v60  ;;  %vm1056_vm8 = vcmp.eq.f32.partialorder %v1055_v34, 8.507059e+37  ;;  %v1287_v8 = vand.u32 2147483648, %v1275_v54  ;;  %v558_v34 = vld [vmem:[%s2225_s28] sm:$0x3] }
 0x23c   : > { %v1285_v58 = vand.u32 2147483647, %v1275_v54 }
 0x23d   : > { %v1023_v52 = vrot.slane %v1022_v26, 1 }
 0x23e   : > { %vm1286_vm14 = vcmp.eq.f32.partialorder %v1285_v58, 8.507059e+37 }
 0x23f   : > { %v1024_v25 = vadd.f32 %v1023_v52, %v1022_v26  ;;  %v1644_v7 = vpop.eup %1643  ;;  %v1288_v52 = vor.u32 1.1754944e-38, %v1287_v8 }
 0x240   : > { %v1047_v11 = vmul.f32 %v1644_v7, %v1030_v41  ;;  %vm1052_vm5 = vweird.f32 %v1644_v7 }
 0x241   : > { %1645 = vrcp.f32 %v1024_v25  ;;  %vm1053_vm7 = vmor %vm1051_vm6, %vm1052_vm5  ;;  %v1042_v48 = vand.u32 2147483648, %v1024_v25  ;;  %v1040_v13 = vand.u32 2147483647, %v1024_v25  ;;  %vm1036_vm9 = vweird.f32 %v1024_v25 }
 0x242   : > { %v1048_v27 = vsub.f32 1.0, %v1047_v11  ;;  %1647 = vrcp.f32 %v1275_v54 }
 0x243   : > { %v1043_v20 = vor.u32 1.1754944e-38, %v1042_v48  ;;  %vm1041_vm2 = vcmp.eq.f32.partialorder %v1040_v13, 8.507059e+37 }
 0x244   : > { %v1049_v0 = vmul.f32 %v1644_v7, %v1048_v27 }
 0x246   : > { %v1050_v3 = vadd.f32 %v1644_v7, %v1049_v0 }
 0x247   : > { %v1646_v2 = vpop.eup %1645 }
 0x248   : > { %v1032_v4 = vmul.f32 %v1646_v2, %v1024_v25  ;;  %v1054_v63 = vsel %vm1053_vm7, %v1644_v7, %v1050_v3  ;;  %vm1037_vm12 = vweird.f32 %v1646_v2  ;;  %v1648_v56 = vpop.eup %1647  ;;  %v559_v3 = vunpack.c.l.bf16 %v558_v34 }
 0x249   : > { %v1059_v5 = vsel %vm1056_vm8, %v1058_v49, %v1054_v63  ;;  %vm1038_vm10 = vmor %vm1036_vm9, %vm1037_vm12  ;;  %v1277_v17 = vmul.f32 %v1648_v56, %v1275_v54  ;;  %vm1282_vm4 = vweird.f32 %v1648_v56 }
 0x24a   : > { %v1033_v9 = vsub.f32 1.0, %v1032_v4  ;;  %v1060_v10 = vmul.f32 %v1640_v53, %v1059_v5  ;;  %vm1283_vm13 = vmor %vm1281_vm3, %vm1282_vm4 }
 0x24b   : > { %v1278_v41 = vsub.f32 1.0, %v1277_v17 }
 0x24c   : > { %v1034_v12 = vmul.f32 %v1646_v2, %v1033_v9  ;;  %1118 = vmatpush.msra.mxu2 %v1060_v10  ;;  %v1295_v10 = vstv %s1265_s19 }
 0x24d   : > { %1474 = vmatmul.msk.f32.vlgmr.msra.gmra.mxu2 %vm1061_vm11, %v944_v61  ;;  %v1279_v26 = vmul.f32 %v1648_v56, %v1278_v41 }
 0x24e   : > { %v1035_v14 = vadd.f32 %v1646_v2, %v1034_v12 }
 0x24f   : > { %v1280_v7 = vadd.f32 %v1648_v56, %v1279_v26 }
 0x250   : > { %v1039_v21 = vsel %vm1038_vm10, %v1646_v2, %v1035_v14 }
 0x251   : > { %v1044_v62 = vsel %vm1041_vm2, %v1043_v20, %v1039_v21  ;;  %v1284_v60 = vsel %vm1283_vm13, %v1648_v56, %v1280_v7 }
 0x252   : > { %v1045_v22 = vmul.f32 %v1642_v55, %v1044_v62 }
 0x254   : > { %1089 = vmatpush.msra.mxu0 %v1045_v22  ;;  %v1293_v22 = vstv %s1263_s26 }
 0x255   : > { %1470 = vmatmul.msk.f32.vlgmr.msra.gmra.mxu0 %vm1061_vm11, %v944_v61  ;;  %1475 = vmatmul.msk.f32.gmra.mxu2 %vm1061_vm11, %v947_v15  ;;  %v1289_v61 = vsel %vm1286_vm14, %v1288_v52, %v1284_v60 }
 0x256   : > { %1550 = vpush %v1289_v61 }
 0x25d   : > { %1471 = vmatmul.msk.f32.gmra.mxu0 %vm1061_vm11, %v947_v15  ;;  %1476 = vmatmul.msk.f32.gmra.mxu2 %vm1061_vm11, %v950_v24 }
 0x265   : > { %1472 = vmatmul.msk.f32.gmra.mxu0 %vm1061_vm11, %v950_v24  ;;  %1477 = vmatmul.msk.f32.gmra.mxu2 %vm1061_vm11, %v953_v31 }
 0x26d   : > { %1473 = vmatmul.msk.f32.gmra.mxu0 %vm1061_vm11, %v953_v31 }
 0x287   : > { %s1551_s27 = spop %1550 }
 0x288   : > { %v1291_v15 = vstv %s1551_s27 }
 0x2d0   : > { %v1120_v33 = vpop.f32.mrf.mxu2 }
 0x2d2   : > { %v1091_v35 = vpop.f32.mrf.mxu0 }
 0x2d8   : > { %v1123_v36 = vpop.f32.mrf.mxu2 }
 0x2da   : > { %v1094_v38 = vpop.f32.mrf.mxu0 }
 0x2e0   : > { %v1126_v23 = vpop.f32.mrf.mxu2 }
 0x2e2   : > { %v1097_v40 = vpop.f32.mrf.mxu0 }
 0x2e8   : > { %v1129_v16 = vpop.f32.mrf.mxu2 }
 0x2e9   : > { %1185 = vmatpush.msra.mxu1 %v1129_v16 }
 0x2ea   : > { %v1100_v59 = vpop.f32.mrf.mxu0 }
 0x2eb   : > { %1156 = vmatpush.msrb.mxu3 %v1100_v59  ;;  %1186 = vmatpush.msra.mxu1 %v1126_v23 }
 0x2ed   : > { %1157 = vmatpush.msrb.mxu3 %v1097_v40  ;;  %1187 = vmatpush.msra.mxu1 %v1123_v36 }
 0x2ef   : > { %1158 = vmatpush.msrb.mxu3 %v1094_v38  ;;  %1188 = vmatpush.msra.mxu1 %v1120_v33 }
 0x2f0   : > { %1482 = vmatmul.msk.f32.vlgmr.msra.gmra.mxu1 %vm821_vm1, %v1537_v28 }
 0x2f1   : > { %1159 = vmatpush.msrb.mxu3 %v1091_v35 }
 0x2f2   : > { %1478 = vmatmul.msk.f32.vlgmr.msrb.gmra.mxu3 %vm821_vm1, %v1537_v28 }
 0x2f8   : > { %1483 = vmatmul.msk.f32.gmra.mxu1 %vm821_vm1, %v1538_v43 }
 0x2fa   : > { %1479 = vmatmul.msk.f32.gmra.mxu3 %vm821_vm1, %v1538_v43 }
 0x300   : > { %1484 = vmatmul.msk.f32.gmra.mxu1 %vm821_vm1, %v1541_v29 }
 0x302   : > { %1480 = vmatmul.msk.f32.gmra.mxu3 %vm821_vm1, %v1541_v29 }
 0x308   : > { %1485 = vmatmul.msk.f32.gmra.mxu1 %vm821_vm1, %v1542_v46 }
 0x30a   : > { %1481 = vmatmul.msk.f32.gmra.mxu3 %vm821_vm1, %v1542_v46 }
 0x36d   : > { %v1190_v50 = vpop.f32.mrf.mxu1 }
 0x36e   : > { %v1203_v49 = vadd.f32 %v1190_v50, %v2046_v45  ;;  %v1213_v45 = vpop.permute.xlu2 %1212 }
 0x375   : > { %v1161_v53 = vpop.f32.mrf.mxu3  ;;  %v1193_v19 = vpop.f32.mrf.mxu1 }
 0x376   : > { %v1205_v2 = vadd.f32 %v1193_v19, %v2038_v39  ;;  %v1202_v39 = vadd.f32 %v1161_v53, %v2089_v37 }
 0x37d   : > { %v1164_v55 = vpop.f32.mrf.mxu3  ;;  %v1196_v51 = vpop.f32.mrf.mxu1 }
 0x37e   : > { %v1207_v0 = vadd.f32 %v1196_v51, %v2012_v32  ;;  %v1204_v63 = vadd.f32 %v1164_v55, %v2084_v57 }
 0x385   : > { %v1167_v25 = vpop.f32.mrf.mxu3  ;;  %v1199_v11 = vpop.f32.mrf.mxu1 }
 0x386   : > { %v1209_v27 = vadd.f32 %v1199_v11, %v1935_v30  ;;  %v1206_v32 = vadd.f32 %v1167_v25, %v2078_v47  ;;  %v1266_v47 = vstv %s1261_s17 }
 0x388   : > { %1250 = vmatpush.msrb.mxu2 %v1209_v27 }
 0x38a   : > { %1251 = vmatpush.msrb.mxu2 %v1207_v0 }
 0x38c   : > { %1252 = vmatpush.msrb.mxu2 %v1205_v2 }
 0x38d   : > { %v1170_v30 = vpop.f32.mrf.mxu3 }
 0x38e   : > { %v1208_v4 = vadd.f32 %v1170_v30, %v2059_v6  ;;  %1253 = vmatpush.msrb.mxu2 %v1203_v49 }
 0x38f   : > { %1487 = vmatmul.msk.f32.vlgmr.msrb.gmra.mxu2 %vm821_vm1, %v559_v3 }
 0x390   : > { %1230 = vmatpush.msrb.mxu0 %v1208_v4 }
 0x392   : > { %1231 = vmatpush.msrb.mxu0 %v1206_v32 }
 0x394   : > { %1232 = vmatpush.msrb.mxu0 %v1204_v63 }
 0x396   : > { %1233 = vmatpush.msrb.mxu0 %v1202_v39 }
 0x397   : > { %1486 = vmatmul.msk.f32.vlgmr.msrb.gmra.mxu0 %vm821_vm1, %v559_v3 }
 0x412   : > { %v1255_v6 = vpop.f32.mrf.mxu2 }
 0x413   : > { %v1256_v5 = vadd.f32 %v1255_v6, %v1213_v45 }
 0x414   : > { %v1235_v9 = vpop.f32.mrf.mxu0 }
 0x415   : > { %v1236_v57 = vadd.f32 %v1235_v9, %v1213_v45  ;;  %v1268_v48 = vmul.f32 %v1266_v47, %v1256_v5  ;;  %v1297_v13 = vmul.f32 %v1295_v10, %v1256_v5 }
 0x417   : > { %v1267_v37 = vmul.f32 %v1266_v47, %v1236_v57  ;;  %v1271_v12 = vrot.slane %v1268_v48, 4  ;;  %v1300_v21 = vrot.slane %v1297_v13, 4  ;;  %v1296_v62 = vmul.f32 %v1295_v10, %v1236_v57 }
 0x419   : > { %v1272_v14 = vsel %vm598_vm0, %v1267_v37, %v1271_v12  ;;  %v1301_v33 = vsel %vm598_vm0, %v1296_v62, %v1300_v21 }
 0x41a   : > { %v1274_v20 = vsub.f32 %v1837_v1, %v1272_v14 }
 0x41c   : > { %v1292_v24 = vmul.f32 %v1291_v15, %v1274_v20 }
 0x41e   : > { %v1294_v31 = vmul.f32 %v1293_v22, %v1292_v24 }
 0x420   : > { %v1303_v35 = vadd.f32 %v1301_v33, %v1294_v31 }
 0x422   : > { %1304 = vst [vmem:[%s1832_s18] sm:$0xff] %v1303_v35 }
 0x423 PF: > { %s2226_s29 = sld [smem:[#allocation7_spill]] }
 0x424   : > { %s2227_s21 = sld [smem:[#allocation5_spill]] }
 0x425   : > { %s2228_s22 = sld [smem:[#allocation6_spill]] }
 0x426   : > { %s2229_s23 = sld [smem:[#allocation8_spill]] }
 0x427   : > { %s2230_s24 = sld [smem:[#allocation9_spill]] }
 0x429   : > { %s23_s25 = sadd.s32 1, %s2226_s29  }
 0x42a   : > { %p20_p11 = scmp.ge.s32.totalorder %s23_s25, 10  }
 0x42c   :  { %22 = sbr.rel (!%p20_p11) target bundleno = 7 (0x7), region = 116 }
 0x431   :  { %1326 = vsyncpa [#allocation3], 1 }
 0x432   :  { %1328 = vsyncpa [#allocation3 + $0x1], 1 }

</bundles_post_ra>
